<compile_context>
chip_gen: v7x
topology: tpu7x:2x2x1
jax: 0.10.0
libtpu: 0.0.40
codegen_flags: <defaults>
</compile_context>

<pallas_src>
import functools
import math

import jax
import jax.numpy as jnp
from jax.experimental import pallas as pl
from jax.experimental.pallas import tpu as pltpu

_EPS = 1e-12


# ---------------------------------------------------------------------------
# In-kernel helpers (traced inside the Pallas kernel bodies; all static shapes)
# ---------------------------------------------------------------------------

def _ln(x, g, b, eps=_EPS):
    mean = jnp.mean(x, axis=-1, keepdims=True)
    var = jnp.mean(jnp.square(x - mean), axis=-1, keepdims=True)
    inv = jax.lax.rsqrt(var + eps)
    return (x - mean) * inv * g + b


def _mha(q, k, v, bias, o_w_ref, o_b, nh):
    """Multi-head attention on per-batch (Sq, H)/(Sk, H) activations.

    The 1/sqrt(Dh) scale is pre-folded into the Q projection weights.  Heads are static
    lane slices; the output projection is accumulated per head (ctx_h @ Wo[h]) so the
    per-head context never leaves vregs.  Matmuls run in bf16 with f32 accumulation;
    softmax stays f32."""
    Dh = q.shape[-1] // nh
    q16 = q.astype(jnp.bfloat16)
    k16 = k.astype(jnp.bfloat16)
    v16 = v.astype(jnp.bfloat16)
    out = None
    for h in range(nh):
        sl = slice(h * Dh, (h + 1) * Dh)
        s = jax.lax.dot_general(q16[:, sl], k16[:, sl], (((1,), (1,)), ((), ())),
                                preferred_element_type=jnp.float32) + bias
        m = jnp.max(s, axis=-1, keepdims=True)
        p = jnp.exp(s - m)
        l = jnp.sum(p, axis=-1, keepdims=True)
        ctx = jnp.dot(p.astype(jnp.bfloat16), v16[:, sl],
                      preferred_element_type=jnp.float32)
        ctx = ctx * pl.reciprocal(l, approx=True)
        part = jnp.dot(ctx.astype(jnp.bfloat16), o_w_ref[h],
                       preferred_element_type=jnp.float32)
        out = part if out is None else out + part
    return out + o_b


def _ffn(x, w1, b1, w2, b2):
    h = jnp.dot(x.astype(jnp.bfloat16), w1, preferred_element_type=jnp.float32) + b1
    h = jax.nn.gelu(h, approximate=True)
    return jnp.dot(h.astype(jnp.bfloat16), w2, preferred_element_type=jnp.float32) + b2


# ---------------------------------------------------------------------------
# Pallas kernels
# ---------------------------------------------------------------------------

def _visual_kernel(col_ref, cw_ref, cb_ref, pw_ref, pb_ref, o_ref):
    col = col_ref[0].astype(jnp.bfloat16)
    feat = jnp.dot(col, cw_ref[...], preferred_element_type=jnp.float32) + cb_ref[...]
    feat = jnp.maximum(feat, 0.0)
    out = jnp.dot(feat.astype(jnp.bfloat16), pw_ref[...],
                  preferred_element_type=jnp.float32) + pb_ref[...]
    o_ref[0] = out.astype(o_ref.dtype)


def _encoder_layer_kernel(x_ref, km_ref,
                          eg_ref, eb_ref,
                          qkvw_ref, qkvb_ref, ow_ref, ob_ref,
                          g1_ref, b1_ref,
                          f1w_ref, f1b_ref, f2w_ref, f2b_ref,
                          g2_ref, b2_ref,
                          o_ref, *, nh):
    # Embedding layernorm (fused from the embed() stage)
    x = _ln(x_ref[0], eg_ref[...], eb_ref[...])
    H = x.shape[-1]
    # Fused QKV projection (Q columns pre-scaled by 1/sqrt(Dh) at init)
    qkv = jnp.dot(x.astype(jnp.bfloat16), qkvw_ref[...],
                  preferred_element_type=jnp.float32) + qkvb_ref[...]
    q, k, v = qkv[:, :H], qkv[:, H:2 * H], qkv[:, 2 * H:]
    # Per-batch key-mask bias, broadcast over query rows.
    bias = jnp.where(km_ref[0] > 0.5, jnp.float32(0.0), jnp.float32(-1e9))   # (1, S)
    attn = _mha(q, k, v, bias, ow_ref, ob_ref[...], nh)
    x = _ln(x + attn, g1_ref[...], b1_ref[...])
    f = _ffn(x, f1w_ref[...], f1b_ref[...], f2w_ref[...], f2b_ref[...])
    o_ref[0] = _ln(x + f, g2_ref[...], b2_ref[...]).astype(o_ref.dtype)


def _cross_kv_kernel(enc_ref, kvw_ref, kvb_ref, o_ref):
    """Once-per-encoder-pass cross-attention K/V projection (decode-time cache)."""
    kv = jnp.dot(enc_ref[0].astype(jnp.bfloat16), kvw_ref[...],
                 preferred_element_type=jnp.float32) + kvb_ref[...]
    o_ref[0] = kv.astype(o_ref.dtype)


def _decoder_layer_kernel(y_ref, ckv_ref, dkm_ref, ekm_ref,
                          eg_ref, eb_ref,
                          sqkvw_ref, sqkvb_ref, sow_ref, sob_ref,
                          g1_ref, b1_ref,
                          cqw_ref, cqb_ref, cow_ref, cob_ref,
                          g2_ref, b2_ref,
                          f1w_ref, f1b_ref, f2w_ref, f2b_ref,
                          g3_ref, b3_ref,
                          o_ref, *, nh):
    # Embedding layernorm
    y = _ln(y_ref[0], eg_ref[...], eb_ref[...])
    T, H = y.shape
    # Causal self-attention (fused QKV, Q pre-scaled)
    qkv = jnp.dot(y.astype(jnp.bfloat16), sqkvw_ref[...],
                  preferred_element_type=jnp.float32) + sqkvb_ref[...]
    q, k, v = qkv[:, :H], qkv[:, H:2 * H], qkv[:, 2 * H:]
    rows = jax.lax.broadcasted_iota(jnp.int32, (T, T), 0)
    cols = jax.lax.broadcasted_iota(jnp.int32, (T, T), 1)
    allowed = (rows >= cols) & (dkm_ref[0] > 0.5)
    self_bias = jnp.where(allowed, jnp.float32(0.0), jnp.float32(-1e9))      # (T, T)
    a = _mha(q, k, v, self_bias, sow_ref, sob_ref[...], nh)
    y = _ln(y + a, g1_ref[...], b1_ref[...])
    # Cross-attention over the cached (linguistic + visual) K/V (Q pre-scaled)
    ckv = ckv_ref[0]                                                        # (Senc, 2H) bf16
    ck, cv = ckv[:, :H], ckv[:, H:]
    cq = jnp.dot(y.astype(jnp.bfloat16), cqw_ref[...],
                 preferred_element_type=jnp.float32) + cqb_ref[...]
    cross_bias = jnp.where(ekm_ref[0] > 0.5, jnp.float32(0.0), jnp.float32(-1e9))  # (1, Senc)
    c = _mha(cq, ck, cv, cross_bias, cow_ref, cob_ref[...], nh)
    y = _ln(y + c, g2_ref[...], b2_ref[...])
    # FFN
    f = _ffn(y, f1w_ref[...], f1b_ref[...], f2w_ref[...], f2b_ref[...])
    o_ref[0] = _ln(y + f, g3_ref[...], b3_ref[...]).astype(o_ref.dtype)


def _lm_head_kernel(x_ref, w_ref, b_ref, o_ref):
    o_ref[...] = (jnp.dot(x_ref[...].astype(jnp.bfloat16), w_ref[...],
                          preferred_element_type=jnp.float32)
                  + b_ref[...]).astype(o_ref.dtype)


# ---------------------------------------------------------------------------
# pallas_call plumbing helpers
# ---------------------------------------------------------------------------

def _cp(*semantics):
    return pltpu.CompilerParams(dimension_semantics=semantics,
                                vmem_limit_bytes=32 * 1024 * 1024)


def _res(arr):
    """Resident (constant-block) BlockSpec for a weight on a rank-1 (batch) grid."""
    nd = arr.ndim

    def imap(b):
        return (0,) * nd

    return pl.BlockSpec(arr.shape, imap)


def _pick_tile(total, candidates):
    for c in candidates:
        if total % c == 0:
            return c
    return total


# ---------------------------------------------------------------------------
# Wrappers (plain-JAX glue around the fused kernels)
# ---------------------------------------------------------------------------

def visual_encode(images_nchw, p):
    """3x3/stride-2 conv (im2col + matmul) + ReLU + projection to H, gridded over batch."""
    B, C, Hh, Ww = images_nchw.shape
    x = jnp.transpose(images_nchw, (0, 2, 3, 1))  # NCHW -> NHWC
    kh = kw = 3
    stride, pad = 2, 1
    xp = jnp.pad(x, ((0, 0), (pad, pad), (pad, pad), (0, 0)))
    OH = (Hh + 2 * pad - kh) // stride + 1
    OW = (Ww + 2 * pad - kw) // stride + 1
    # TODO(synk): patch (im2col) extraction stays in plain JAX; at real DenseNet-scale inputs
    # the 9 tap matmuls should be accumulated in-kernel to avoid the 9x-inflated HBM matrix.
    cols = []
    for i in range(kh):
        for j in range(kw):
            cols.append(xp[:, i:i + stride * OH:stride, j:j + stride * OW:stride, :])
    col = jnp.concatenate(cols, axis=-1).reshape(B, OH * OW, kh * kw * C)
    H = p["proj_w"].shape[1]
    N = OH * OW
    vis = pl.pallas_call(
        _visual_kernel,
        out_shape=jax.ShapeDtypeStruct((B, N, H), jnp.float32),
        grid=(B,),
        in_specs=[pl.BlockSpec((1, N, kh * kw * C), lambda b: (b, 0, 0)),
                  _res(p["conv_w"]), _res(p["conv_b"]),
                  _res(p["proj_w"]), _res(p["proj_b"])],
        out_specs=pl.BlockSpec((1, N, H), lambda b: (b, 0, 0)),
        compiler_params=_cp("parallel"),
    )(col, p["conv_w"], p["conv_b"], p["proj_w"], p["proj_b"])
    vis_mask = jnp.ones((B, N), jnp.float32)
    return vis, vis_mask


def embed_lookup(ids, p):
    B, S = ids.shape
    return p["word"][ids] + p["pos"][None, :S]        # LN is fused into the layer kernels


def encoder_forward(emb, key_mask, p, nh):
    B, S, H = emb.shape
    km = key_mask.reshape(B, 1, S).astype(jnp.float32)
    weights = [p["emb_ln"]["g"], p["emb_ln"]["b"],
               p["qkv"]["w"], p["qkv"]["b"], p["o"]["w"], p["o"]["b"],
               p["ln1"]["g"], p["ln1"]["b"],
               p["ffn1"]["w"], p["ffn1"]["b"], p["ffn2"]["w"], p["ffn2"]["b"],
               p["ln2"]["g"], p["ln2"]["b"]]
    return pl.pallas_call(
        functools.partial(_encoder_layer_kernel, nh=nh),
        out_shape=jax.ShapeDtypeStruct((B, S, H), jnp.float32),
        grid=(B,),
        in_specs=[pl.BlockSpec((1, S, H), lambda b: (b, 0, 0)),
                  pl.BlockSpec((1, 1, S), lambda b: (b, 0, 0))] + [_res(w) for w in weights],
        out_specs=pl.BlockSpec((1, S, H), lambda b: (b, 0, 0)),
        compiler_params=_cp("parallel"),
    )(emb, km, *weights)


def cross_kv_project(enc_states, p):
    B, Senc, H = enc_states.shape
    return pl.pallas_call(
        _cross_kv_kernel,
        out_shape=jax.ShapeDtypeStruct((B, Senc, 2 * H), jnp.bfloat16),
        grid=(B,),
        in_specs=[pl.BlockSpec((1, Senc, H), lambda b: (b, 0, 0)),
                  _res(p["cross_kv"]["w"]), _res(p["cross_kv"]["b"])],
        out_specs=pl.BlockSpec((1, Senc, 2 * H), lambda b: (b, 0, 0)),
        compiler_params=_cp("parallel"),
    )(enc_states, p["cross_kv"]["w"], p["cross_kv"]["b"])


def decoder_forward(y_emb, dec_key_mask, cross_kv, enc_key_mask, p, nh):
    B, T, H = y_emb.shape
    Senc = cross_kv.shape[1]
    dkm = dec_key_mask.reshape(B, 1, T).astype(jnp.float32)
    ekm = enc_key_mask.reshape(B, 1, Senc).astype(jnp.float32)
    weights = [p["emb_ln"]["g"], p["emb_ln"]["b"],
               p["self_qkv"]["w"], p["self_qkv"]["b"], p["self_o"]["w"], p["self_o"]["b"],
               p["ln1"]["g"], p["ln1"]["b"],
               p["cross_q"]["w"], p["cross_q"]["b"], p["cross_o"]["w"], p["cross_o"]["b"],
               p["ln2"]["g"], p["ln2"]["b"],
               p["ffn1"]["w"], p["ffn1"]["b"], p["ffn2"]["w"], p["ffn2"]["b"],
               p["ln3"]["g"], p["ln3"]["b"]]
    return pl.pallas_call(
        functools.partial(_decoder_layer_kernel, nh=nh),
        out_shape=jax.ShapeDtypeStruct((B, T, H), jnp.float32),
        grid=(B,),
        in_specs=[pl.BlockSpec((1, T, H), lambda b: (b, 0, 0)),
                  pl.BlockSpec((1, Senc, 2 * H), lambda b: (b, 0, 0)),
                  pl.BlockSpec((1, 1, T), lambda b: (b, 0, 0)),
                  pl.BlockSpec((1, 1, Senc), lambda b: (b, 0, 0))] + [_res(w) for w in weights],
        out_specs=pl.BlockSpec((1, T, H), lambda b: (b, 0, 0)),
        compiler_params=_cp("parallel"),
    )(y_emb, cross_kv, dkm, ekm, *weights)


def lm_head(hidden, p, vocab_tgt):
    """LM head tiled over (rows, vocab) so the (H, V) weight streams through VMEM."""
    B, T, H = hidden.shape
    M = B * T
    x = hidden.reshape(M, H)
    Vpad = p["lm"]["w"].shape[1]
    tn = _pick_tile(Vpad, (2048, 1024, 512, 256, 128))
    tm = _pick_tile(M, (256, 128)) if M >= 128 else M
    logits = pl.pallas_call(
        _lm_head_kernel,
        out_shape=jax.ShapeDtypeStruct((M, Vpad), jnp.float32),
        grid=(M // tm, Vpad // tn),
        in_specs=[pl.BlockSpec((tm, H), lambda i, j: (i, 0)),
                  pl.BlockSpec((H, tn), lambda i, j: (0, j)),
                  pl.BlockSpec((1, tn), lambda i, j: (0, j))],
        out_specs=pl.BlockSpec((tm, tn), lambda i, j: (i, j)),
        compiler_params=_cp("parallel", "parallel"),
    )(x, p["lm"]["w"], p["lm"]["b"])
    return logits[:, :vocab_tgt].reshape(B, T, vocab_tgt)


def rrg_multi_encode(params, input_ids, attention_mask, images, images_mask=None):
    nh = params["cfg"]["num_heads"]
    visual_features, visual_mask = visual_encode(images, params["cnn"])
    emb = embed_lookup(input_ids, params["enc_embed"])
    last_hidden_state = encoder_forward(emb, attention_mask.astype(jnp.float32),
                                        params["enc_layer"], nh)
    encoder_hidden_states = jnp.concatenate([last_hidden_state, visual_features], axis=1)
    encoder_attention_mask = jnp.concatenate(
        [attention_mask.astype(jnp.float32), visual_mask], axis=-1)
    return encoder_hidden_states, encoder_attention_mask


def rrg_multi_forward(params, input_ids, attention_mask, decoder_input_ids,
                      decoder_attention_mask, images, images_mask=None,
                      encoder_outputs=None, encoder_attention_mask=None):
    cfg = params["cfg"]
    if encoder_outputs is None:
        encoder_outputs, encoder_attention_mask = rrg_multi_encode(
            params, input_ids, attention_mask, images, images_mask)
    # Cross-attention K/V cache: computed once per encoder pass, reused by every decode step.
    cross_kv = cross_kv_project(encoder_outputs, params["dec_layer"])
    y_emb = embed_lookup(decoder_input_ids, params["dec_embed"])
    hidden = decoder_forward(y_emb, decoder_attention_mask.astype(jnp.float32),
                             cross_kv, encoder_attention_mask,
                             params["dec_layer"], cfg["num_heads"])
    return lm_head(hidden, params["dec_layer"], cfg["vocab_tgt"])


# ---------------------------------------------------------------------------
# Deterministic parameter initialization (bf16 matmul weights, f32 LN/bias)
# ---------------------------------------------------------------------------

def init_params(key, cfg):
    H, F = cfg["hidden"], cfg["ffn"]
    nh = cfg["num_heads"]
    Dh = H // nh
    scale = 1.0 / math.sqrt(Dh)
    Vpad = cfg["vocab_tgt_pad"]
    keys = iter(jax.random.split(key, 64))

    def w(shape):
        return jax.random.normal(next(keys), shape, jnp.float32) * 0.02

    def dense(fi, fo):
        return {"w": w((fi, fo)).astype(jnp.bfloat16),
                "b": jnp.zeros((1, fo), jnp.float32)}

    def out_proj():
        # Stored (nh, Dh, H): per-head slice is a first-axis ref index in-kernel.
        return {"w": w((nh, Dh, H)).astype(jnp.bfloat16),
                "b": jnp.zeros((1, H), jnp.float32)}

    def qkv_dense():
        # Fused QKV (H, 3H); fold 1/sqrt(Dh) into the Q columns (and Q bias) at init.
        wq = w((H, 3 * H))
        col_scale = jnp.concatenate([jnp.full((H,), scale, jnp.float32),
                                     jnp.ones((2 * H,), jnp.float32)])
        return {"w": (wq * col_scale).astype(jnp.bfloat16),
                "b": jnp.zeros((1, 3 * H), jnp.float32) * col_scale}

    def q_dense():
        return {"w": (w((H, H)) * scale).astype(jnp.bfloat16),
                "b": jnp.zeros((1, H), jnp.float32) * scale}

    def ln():
        return {"g": jnp.ones((1, H), jnp.float32), "b": jnp.zeros((1, H), jnp.float32)}

    return {
        "cfg": cfg,
        "cnn": {
            # conv weight stored as (kh*kw*in_ch, out_ch) matching im2col patch ordering
            "conv_w": w((3 * 3 * cfg["img_ch"], cfg["conv_out"])).astype(jnp.bfloat16),
            "conv_b": jnp.zeros((1, cfg["conv_out"]), jnp.float32),
            "proj_w": w((cfg["conv_out"], H)).astype(jnp.bfloat16),
            "proj_b": jnp.zeros((1, H), jnp.float32),
        },
        "enc_embed": {"word": w((cfg["vocab_src"], H)), "pos": w((cfg["max_pos"], H))},
        "enc_layer": {"emb_ln": ln(),
                      "qkv": qkv_dense(), "o": out_proj(), "ln1": ln(),
                      "ffn1": dense(H, F), "ffn2": dense(F, H), "ln2": ln()},
        "dec_embed": {"word": w((cfg["vocab_tgt"], H)), "pos": w((cfg["max_pos"], H))},
        "dec_layer": {"emb_ln": ln(),
                      "self_qkv": qkv_dense(), "self_o": out_proj(), "ln1": ln(),
                      "cross_q": q_dense(), "cross_kv": dense(H, 2 * H),
                      "cross_o": out_proj(), "ln2": ln(),
                      "ffn1": dense(H, F), "ffn2": dense(F, H), "ln3": ln(),
                      # LM head padded to a 128-lane multiple; extra columns sliced off
                      "lm": dense(H, Vpad)},
    }


# ---------------------------------------------------------------------------
# Main
# ---------------------------------------------------------------------------

if __name__ == "__main__":
    cfg = dict(vocab_src=50, vocab_tgt=60, vocab_tgt_pad=128, hidden=32, num_heads=4,
               ffn=64, max_pos=128, img_ch=3, conv_out=16)
    key = jax.random.PRNGKey(0)
    pk, dk = jax.random.split(key)
    params = init_params(pk, cfg)

    B, S, T = 2, 8, 8
    k1, k2, k3 = jax.random.split(dk, 3)
    input_ids = jax.random.randint(k1, (B, S), 0, cfg["vocab_src"])
    attention_mask = jnp.ones((B, S), jnp.float32).at[1, 6:].set(0.0)
    decoder_input_ids = jax.random.randint(k2, (B, T), 0, cfg["vocab_tgt"])
    decoder_attention_mask = jnp.ones((B, T), jnp.float32).at[0, 7:].set(0.0)
    images = jax.random.normal(k3, (B, 3, 16, 16), jnp.float32)  # NCHW, like PyTorch

    logits = rrg_multi_forward(params, input_ids, attention_mask, decoder_input_ids,
                               decoder_attention_mask, images)
    jax.block_until_ready(logits)
    assert logits.shape == (B, T, cfg["vocab_tgt"]), logits.shape
    assert bool(jnp.all(jnp.isfinite(logits)))
    print("KERNEL_OK")
</pallas_src>

<mosaic_0001>
module attributes {stable_mosaic.version = 11 : i64} {
  func.func @_visual_kernel(%arg0: i32, %arg1: memref<1x64x27xf32, #tpu.memory_space<vmem>>, %arg2: memref<27x16xbf16, #tpu.memory_space<vmem>>, %arg3: memref<1x16xf32, #tpu.memory_space<vmem>>, %arg4: memref<16x32xbf16, #tpu.memory_space<vmem>>, %arg5: memref<1x32xf32, #tpu.memory_space<vmem>>, %arg6: memref<1x64x32xf32, #tpu.memory_space<vmem>>) attributes {dimension_semantics = [#tpu.dimension_semantics<parallel>], iteration_bounds = array<i64: 2>, scalar_prefetch = 0 : i64, scratch_operands = 0 : i64, tpu.core_type = #tpu.core_type<tc>, window_params = [{transform_indices = @transform_0, window_bounds = array<i64: 1, 64, 27>}, {pipeline_mode = #tpu.pipeline_mode<synchronous>, transform_indices = @transform_1, window_bounds = array<i64: 27, 16>}, {pipeline_mode = #tpu.pipeline_mode<synchronous>, transform_indices = @transform_2, window_bounds = array<i64: 1, 16>}, {pipeline_mode = #tpu.pipeline_mode<synchronous>, transform_indices = @transform_3, window_bounds = array<i64: 16, 32>}, {pipeline_mode = #tpu.pipeline_mode<synchronous>, transform_indices = @transform_4, window_bounds = array<i64: 1, 32>}, {transform_indices = @transform_5, window_bounds = array<i64: 1, 64, 32>}]} {
    %c0 = arith.constant 0 : index
    %c0_0 = arith.constant 0 : index
    %c0_1 = arith.constant 0 : index
    %0 = vector.load %arg1[%c0, %c0_0, %c0_1] : memref<1x64x27xf32, #tpu.memory_space<vmem>>, vector<1x64x27xf32>
    %1 = vector.shape_cast %0 : vector<1x64x27xf32> to vector<64x27xf32>
    %2 = arith.truncf %1 : vector<64x27xf32> to vector<64x27xbf16>
    %c0_2 = arith.constant 0 : index
    %c0_3 = arith.constant 0 : index
    %3 = vector.load %arg2[%c0_2, %c0_3] : memref<27x16xbf16, #tpu.memory_space<vmem>>, vector<27x16xbf16>
    %cst = arith.constant dense<0.000000e+00> : vector<64x16xf32>
    %4 = tpu.matmul %2, %3, %cst {dimension_numbers = #tpu.dot_dimension_numbers<[1], [0], [0], [1], [0, 0, 1, 1], [], []>} : vector<64x27xbf16>, vector<27x16xbf16>, vector<64x16xf32> -> vector<64x16xf32>
    %c0_4 = arith.constant 0 : index
    %c0_5 = arith.constant 0 : index
    %5 = vector.load %arg3[%c0_4, %c0_5] : memref<1x16xf32, #tpu.memory_space<vmem>>, vector<1x16xf32>
    %6 = vector.broadcast %5 : vector<1x16xf32> to vector<64x16xf32>
    %7 = arith.addf %4, %6 : vector<64x16xf32>
    %cst_6 = arith.constant 0.000000e+00 : f32
    %8 = vector.broadcast %cst_6 : f32 to vector<64x16xf32>
    %9 = arith.maximumf %7, %8 : vector<64x16xf32>
    %10 = arith.truncf %9 : vector<64x16xf32> to vector<64x16xbf16>
    %c0_7 = arith.constant 0 : index
    %c0_8 = arith.constant 0 : index
    %11 = vector.load %arg4[%c0_7, %c0_8] : memref<16x32xbf16, #tpu.memory_space<vmem>>, vector<16x32xbf16>
    %cst_9 = arith.constant dense<0.000000e+00> : vector<64x32xf32>
    %12 = tpu.matmul %10, %11, %cst_9 {dimension_numbers = #tpu.dot_dimension_numbers<[1], [0], [0], [1], [0, 0, 1, 1], [], []>} : vector<64x16xbf16>, vector<16x32xbf16>, vector<64x32xf32> -> vector<64x32xf32>
    %c0_10 = arith.constant 0 : index
    %c0_11 = arith.constant 0 : index
    %13 = vector.load %arg5[%c0_10, %c0_11] : memref<1x32xf32, #tpu.memory_space<vmem>>, vector<1x32xf32>
    %14 = vector.broadcast %13 : vector<1x32xf32> to vector<64x32xf32>
    %15 = arith.addf %12, %14 : vector<64x32xf32>
    %c0_12 = arith.constant 0 : index
    %c0_13 = arith.constant 0 : index
    %c0_14 = arith.constant 0 : index
    %16 = vector.load %arg6[%c0_12, %c0_13, %c0_14] : memref<1x64x32xf32, #tpu.memory_space<vmem>>, vector<1x64x32xf32>
    %17 = vector.shape_cast %16 : vector<1x64x32xf32> to vector<64x32xf32>
    %18 = vector.shape_cast %15 : vector<64x32xf32> to vector<1x64x32xf32>
    tpu.vector_store %arg6[%c0_12, %c0_13, %c0_14], %18 {strides = array<i32>} : memref<1x64x32xf32, #tpu.memory_space<vmem>>, vector<1x64x32xf32>,
    return
  }
  func.func @transform_0(%arg0: i32) -> (i32, i32, i32) {
    %c0_i32 = arith.constant 0 : i32
    %c0_i32_0 = arith.constant 0 : i32
    %c0_i32_1 = arith.constant 0 : i32
    return %arg0, %c0_i32, %c0_i32_0 : i32, i32, i32
  }
  func.func @transform_1(%arg0: i32) -> (i32, i32) {
    %c0_i32 = arith.constant 0 : i32
    %c0_i32_0 = arith.constant 0 : i32
    %c0_i32_1 = arith.constant 0 : i32
    return %c0_i32, %c0_i32_0 : i32, i32
  }
  func.func @transform_2(%arg0: i32) -> (i32, i32) {
    %c0_i32 = arith.constant 0 : i32
    %c0_i32_0 = arith.constant 0 : i32
    %c0_i32_1 = arith.constant 0 : i32
    return %c0_i32, %c0_i32_0 : i32, i32
  }
  func.func @transform_3(%arg0: i32) -> (i32, i32) {
    %c0_i32 = arith.constant 0 : i32
    %c0_i32_0 = arith.constant 0 : i32
    %c0_i32_1 = arith.constant 0 : i32
    return %c0_i32, %c0_i32_0 : i32, i32
  }
  func.func @transform_4(%arg0: i32) -> (i32, i32) {
    %c0_i32 = arith.constant 0 : i32
    %c0_i32_0 = arith.constant 0 : i32
    %c0_i32_1 = arith.constant 0 : i32
    return %c0_i32, %c0_i32_0 : i32, i32
  }
  func.func @transform_5(%arg0: i32) -> (i32, i32, i32) {
    %c0_i32 = arith.constant 0 : i32
    %c0_i32_0 = arith.constant 0 : i32
    %c0_i32_1 = arith.constant 0 : i32
    return %arg0, %c0_i32, %c0_i32_0 : i32, i32, i32
  }
}

</mosaic_0001>

<bundles_post_ra>
// kernel: tpu_custom_call.1
= control target key start
LH: loop header
LB: loop body
LE: loop exit
PB: predicated region body
PF: predicated region fallthrough
CT: control target
= control target key end

     0   :  { %s624_s18 = smov 0   ;;  %s675_s0 = inlined_call_operand.vmem [shape: f32[2,64,27], index: 0, kind: input, shape index: {}]   ;;  %s676_s1 = inlined_call_operand.vmem [shape: bf16[27,16], index: 1, kind: input, shape index: {}]   ;;  %s677_s2 = inlined_call_operand.vmem [shape: f32[1,16], index: 2, kind: input, shape index: {}]   ;;  %s678_s3 = inlined_call_operand.vmem [shape: bf16[16,32], index: 3, kind: input, shape index: {}]   ;;  %s679_s4 = inlined_call_operand.vmem [shape: f32[1,32], index: 4, kind: input, shape index: {}]   ;;  %s680_s5 = inlined_call_operand.vmem [shape: f32[2,64,32], index: 5, kind: output, shape index: {}]  }
   0x1 LB: > { %s514_s19 = sadd.s32 4294967295, %s591_s18   ;;  %p518_p0 = scmp.ge.s32.totalorder %s591_s18, 1  ;;  %s591_s18 = sphi %s624_s18, %s15_s18  }
   0x2   : > { %p187_p1 = scmp.lt.s32.totalorder %s591_s18, 3 }
   0x4   : > { %p188_p2 = pnand %p518_p0, %p187_p1 }
   0x5   : > { %v582_v0 = vld [vmem:[%s676_s1] sm:$0xff] (!%p188_p2)   ;;  %vm273_vm0 = vcmask (!%p188_p2), 1044480   ;;  %v583_v1 = vld [vmem:[%s676_s1 + $0x8] sm:$0x3f] (!%p188_p2)   ;;  %vm274_vm1 = vcmask (!%p188_p2), 1045504   ;;  %p215_p3 = scmp.lt.s32.totalorder (!%p188_p2), %s514_s19, 1 }
   0x6   : > { %191 = sbr.rel (%p188_p2) target bundleno = 468 (0x1d4), region = 40  ;;  %551 = vmatprep.subr.bf16.mxu0 (!%p188_p2), %v582_v0  ;;  %v593_v2 = vmov (!%p188_p2), 65535   ;;  %vm260_vm2 = vcmask (!%p188_p2), 220160   ;;  %v584_v18 = vld [vmem:[%s678_s3] sm:$0xff] (!%p188_p2)   ;;  %vm372_vm3 = vcmask (!%p188_p2), 130048   ;;  %vm450_vm4 = vcmask (!%p188_p2), 261120  }
   0x7   : > { %552 = vmatpush3.bf16.msra.mxu0 (!%p188_p2), %v582_v0  ;;  %v275_v3 = vsel (!%p188_p2), %vm273_vm0, 4294967295, %v593_v2  ;;  %563 = vmatprep.subr.bf16.mxu1 (!%p188_p2), %v584_v18  ;;  %v523_v19 = vld [vmem:[%s677_s2] ss:$0 sm:$0xff] (!%p188_p2) }
   0x8   : > { %v276_v4 = vsel (!%p188_p2), %vm274_vm1, %v275_v3, 0  ;;  %564 = vmatpush3.bf16.msra.mxu1 (!%p188_p2), %v584_v18  ;;  %v530_v48 = vld [vmem:[%s679_s4] ss:$0 sm:$0xff] (!%p188_p2) }
   0x9   : > { %v278_v5 = vand.u32 (!%p188_p2), %v583_v1, %v276_v4 }
   0xb   : > { %553 = vmatprep.subr.bf16.mxu0 (!%p188_p2), %v278_v5 }
   0xc   : > { %554 = vmatpush3.bf16.msra.mxu0 (!%p188_p2), %v278_v5 }
   0xd   : > { %s682_s19 = smov (!%p215_p3, %s514_s19), 1 }
   0xe   : > { %s538_s24 = sshll.u32 %s682_s19, 6 }
   0xf   : > { %s219_s27 = scalar_lea.vmem %s675_s0, %s538_s24  ;;  %s224_s11 = scalar_lea.vmem %s680_s5, %s538_s24 }
  0x10   : > { %v226_v6 = vld [vmem:[%s219_s27] sm:$0xff]  ;;  %v227_v7 = vld [vmem:[%s219_s27 + $0x8] sm:$0xff]  ;;  %v228_v8 = vld [vmem:[%s219_s27 + $0x10] sm:$0xff] }
  0x11   : > { %v234_v9 = vpack.c.bf16 %v227_v7, %v226_v6  ;;  %v229_v10 = vld [vmem:[%s219_s27 + $0x18] sm:$0xff]  ;;  %v230_v11 = vld [vmem:[%s219_s27 + $0x20] sm:$0xff]  ;;  %v231_v12 = vld [vmem:[%s219_s27 + $0x28] sm:$0xff] }
  0x12   : > { %v235_v13 = vpack.c.bf16 %v229_v10, %v228_v8  ;;  %v236_v14 = vpack.c.bf16 %v231_v12, %v230_v11  ;;  %v232_v15 = vld [vmem:[%s219_s27 + $0x30] sm:$0xff]  ;;  %v233_v16 = vld [vmem:[%s219_s27 + $0x38] sm:$0xff] }
  0x13   : > { %555 = vmatprep.mubr.msk.bf16.mxu0 %vm260_vm2, %v234_v9  ;;  %v237_v17 = vpack.c.bf16 %v233_v16, %v232_v15 }
  0x14   : > { %556 = vmatmul.mubr.msk.bf16.vlgmr.msra.gmra.mrb[0].mxu0 %vm260_vm2, %v235_v13 }
  0x15   : > { %559 = vmatprep.mubr.msk.bf16.mxu0 %vm260_vm2, %v236_v14 }
  0x1c   : > { %560 = vmatmul.mubr.msk.bf16.gmra.mrb[4].mxu0 %vm260_vm2, %v237_v17 }
  0xe7   : > { %v557_v20 = vpop.f32.mrb[0].mxu0 }
  0xe8   : > { %v323_v21 = vadd.f32 %v557_v20, %v523_v19  ;;  %v314_v22 = vpop.f32.mrb[1].mxu0 }
  0xe9   : > { %v315_v23 = vadd.f32 %v523_v19, %v314_v22  ;;  %v558_v24 = vpop.f32.mrb[2].mxu0 }
  0xea   : > { %v326_v25 = vadd.f32 %v558_v24, %v523_v19  ;;  %v317_v26 = vpop.f32.mrb[3].mxu0  ;;  %v347_v28 = vmax.f32 %v323_v21, 0.0 }
  0xeb   : > { %v318_v27 = vadd.f32 %v523_v19, %v317_v26  ;;  %v345_v30 = vmax.f32 %v315_v23, 0.0 }
  0xec   : > { %v348_v29 = vmax.f32 %v326_v25, 0.0 }
  0xed   : > { %v346_v31 = vmax.f32 %v318_v27, 0.0 }
  0xee   : > { %v354_v32 = vpack.c.bf16 %v348_v29, %v347_v28 }
  0xef   : > { %v561_v33 = vpop.f32.mrb[4].mxu0  ;;  %v353_v34 = vpack.c.bf16 %v346_v31, %v345_v30 }
  0xf0   : > { %v339_v35 = vadd.f32 %v561_v33, %v523_v19  ;;  %v330_v36 = vpop.f32.mrb[5].mxu0 }
  0xf1   : > { %v331_v37 = vadd.f32 %v523_v19, %v330_v36  ;;  %v562_v38 = vpop.f32.mrb[6].mxu0  ;;  %565 = vmatprep.mubr.msk.bf16.mxu1 %vm372_vm3, %v353_v34 }
  0xf2   : > { %v342_v39 = vadd.f32 %v562_v38, %v523_v19  ;;  %v333_v40 = vpop.f32.mrb[7].mxu0  ;;  %566 = vmatmul.mubr.msk.bf16.vlgmr.msra.gmra.mrb[0].mxu1 %vm372_vm3, %v354_v32  ;;  %v351_v42 = vmax.f32 %v339_v35, 0.0 }
  0xf3   : > { %v334_v41 = vadd.f32 %v523_v19, %v333_v40  ;;  %v349_v44 = vmax.f32 %v331_v37, 0.0 }
  0xf4   : > { %v352_v43 = vmax.f32 %v342_v39, 0.0 }
  0xf5   : > { %v350_v45 = vmax.f32 %v334_v41, 0.0 }
  0xf6   : > { %v356_v46 = vpack.c.bf16 %v352_v43, %v351_v42 }
  0xf7   : > { %v355_v47 = vpack.c.bf16 %v350_v45, %v349_v44 }
  0xf9   : > { %569 = vmatprep.mubr.msk.bf16.mxu1 %vm372_vm3, %v355_v47 }
  0xfa   : > { %570 = vmatmul.mubr.msk.bf16.gmra.mrb[4].mxu1 %vm372_vm3, %v356_v46 }
 0x1c5   : > { %v567_v49 = vpop.f32.mrb[0].mxu1 }
 0x1c6   : > { %v428_v50 = vadd.f32 %v567_v49, %v530_v48  ;;  %v419_v51 = vpop.f32.mrb[1].mxu1 }
 0x1c7   : > { %v420_v52 = vadd.f32 %v530_v48, %v419_v51  ;;  %v568_v53 = vpop.f32.mrb[2].mxu1 }
 0x1c8   : > { %453 = vst.msk [vmem:[%s224_s11 + $0x10] sm:$0xff] %vm450_vm4, %v428_v50  ;;  %v431_v54 = vadd.f32 %v568_v53, %v530_v48  ;;  %v422_v55 = vpop.f32.mrb[3].mxu1 }
 0x1c9   : > { %451 = vst.msk [vmem:[%s224_s11] sm:$0xff] %vm450_vm4, %v420_v52  ;;  %v423_v56 = vadd.f32 %v530_v48, %v422_v55 }
 0x1ca   : > { %454 = vst.msk [vmem:[%s224_s11 + $0x18] sm:$0xff] %vm450_vm4, %v431_v54 }
 0x1cb   : > { %452 = vst.msk [vmem:[%s224_s11 + $0x8] sm:$0xff] %vm450_vm4, %v423_v56 }
 0x1cd   : > { %v571_v57 = vpop.f32.mrb[4].mxu1 }
 0x1ce   : > { %v444_v58 = vadd.f32 %v571_v57, %v530_v48  ;;  %v435_v59 = vpop.f32.mrb[5].mxu1 }
 0x1cf   : > { %v436_v60 = vadd.f32 %v530_v48, %v435_v59  ;;  %v572_v61 = vpop.f32.mrb[6].mxu1 }
 0x1d0   : > { %457 = vst.msk [vmem:[%s224_s11 + $0x30] sm:$0xff] %vm450_vm4, %v444_v58  ;;  %v447_v62 = vadd.f32 %v572_v61, %v530_v48  ;;  %v438_v63 = vpop.f32.mrb[7].mxu1 }
 0x1d1   : > { %455 = vst.msk [vmem:[%s224_s11 + $0x20] sm:$0xff] %vm450_vm4, %v436_v60  ;;  %v439_v0 = vadd.f32 %v530_v48, %v438_v63 }
 0x1d2   : > { %458 = vst.msk [vmem:[%s224_s11 + $0x38] sm:$0xff] %vm450_vm4, %v447_v62 }
 0x1d3   : > { %456 = vst.msk [vmem:[%s224_s11 + $0x28] sm:$0xff] %vm450_vm4, %v439_v0 }
 0x1d4 PF: > { %s15_s18 = sadd.s32 1, %s591_s18  }
 0x1d5   : > { %p12_p4 = scmp.ge.s32.totalorder %s15_s18, 4  }
 0x1d7   :  { %14 = sbr.rel (!%p12_p4) target bundleno = 1 (0x1), region = 70 }

</bundles_post_ra>
